<compile_context>
chip_gen: v6e
topology: v6e:2x2x1
jax: 0.10.0
libtpu: 0.0.40
codegen_flags: <defaults>
</compile_context>

<pallas_src>
import functools
import math

import jax
import jax.numpy as jnp
from jax.experimental import pallas as pl
from jax.experimental.pallas import tpu as pltpu


# ----------------------------- quantization ---------------------------------
def _quant_levels(num_bits):
    return float(2 ** (int(num_bits) - 1) - 1)


def fake_quant_host(x, num_bits):
    """Setup-time fake quantization (static weights)."""
    if num_bits is None or int(num_bits) <= 0:
        return x
    levels = _quant_levels(num_bits)
    scale = jnp.max(jnp.abs(x)) + 1e-8
    return jnp.round(x * (levels / scale)) * (scale / levels)


def quant_multipliers(x, num_bits):
    """Global activation-quant multipliers [qmul, dmul] as a (2,) f32 array.

    Computed once per activation (whole-tensor max-abs) so that any M/K/N
    tiling inside the kernels stays numerically identical to the reference
    per-tensor quantizer."""
    if num_bits is None or int(num_bits) <= 0:
        return jnp.ones((2,), jnp.float32)
    levels = jnp.float32(_quant_levels(num_bits))
    scale = jnp.max(jnp.abs(x)).astype(jnp.float32) + jnp.float32(1e-8)
    return jnp.stack([levels / scale, scale / levels])


def _pick_tile(dim, candidates):
    for c in candidates:
        if dim % c == 0:
            return c
    return dim


_VMEM_LIMIT = 64 * 1024 * 1024


# ------------------------- quantized linear (+gelu) -------------------------
def _qlinear_kernel(qd_ref, x_ref, w_ref, b_ref, o_ref, *, num_bits, act):
    # qd_ref: (2,) f32 in SMEM (scalar prefetch) = [qmul, dmul]
    # x_ref: (tm, K), w_ref: (K, tn) bf16 pre-quantized, b_ref: (1, tn) f32
    x = x_ref[...].astype(jnp.float32)
    if num_bits > 0:
        x = jnp.round(x * qd_ref[0]) * qd_ref[1]
    y = jnp.dot(x.astype(jnp.bfloat16), w_ref[...],
                preferred_element_type=jnp.float32) + b_ref[...]
    if act == "gelu":
        # TODO(synk): exact-erf GELU replaced by tanh approximation.
        y = jax.nn.gelu(y, approximate=True)
    o_ref[...] = y.astype(o_ref.dtype)


def qlinear(x2d, qd, w_t_bf16, bias, num_bits, act=None,
            out_dtype=jnp.bfloat16):
    """x2d: (M, K); qd: (2,) f32 quant multipliers; w_t_bf16: (K, N) bf16
    pre-quantized (in,out) weights; bias: (N,) f32."""
    M, K = x2d.shape
    K2, N = w_t_bf16.shape
    assert K == K2
    tm = _pick_tile(M, (512, 256, 128))
    tn = _pick_tile(N, (512, 256, 128))
    grid = (M // tm, N // tn)
    kernel = functools.partial(_qlinear_kernel, num_bits=int(num_bits), act=act)
    return pl.pallas_call(
        kernel,
        out_shape=jax.ShapeDtypeStruct((M, N), out_dtype),
        grid_spec=pltpu.PrefetchScalarGridSpec(
            num_scalar_prefetch=1,
            grid=grid,
            in_specs=[
                pl.BlockSpec((tm, K), lambda i, j, qd_: (i, 0)),
                pl.BlockSpec((K, tn), lambda i, j, qd_: (0, j)),
                pl.BlockSpec((1, tn), lambda i, j, qd_: (0, j)),
            ],
            out_specs=pl.BlockSpec((tm, tn), lambda i, j, qd_: (i, j)),
        ),
        compiler_params=pltpu.CompilerParams(
            dimension_semantics=("parallel", "parallel"),
            vmem_limit_bytes=_VMEM_LIMIT),
    )(qd, x2d, w_t_bf16, bias.reshape(1, N))


# ------------------- quantized dense + residual + LayerNorm -----------------
def _qdense_res_ln_kernel(qd_ref, x_ref, w_ref, res_ref, b_ref, g_ref,
                          beta_ref, o_ref, acc_ref, *, num_bits, eps):
    k = pl.program_id(1)

    @pl.when(k == 0)
    def _():
        acc_ref[...] = jnp.zeros(acc_ref.shape, jnp.float32)

    x = x_ref[...].astype(jnp.float32)
    if num_bits > 0:
        x = jnp.round(x * qd_ref[0]) * qd_ref[1]
    acc_ref[...] += jnp.dot(x.astype(jnp.bfloat16), w_ref[...],
                            preferred_element_type=jnp.float32)

    @pl.when(k == pl.num_programs(1) - 1)
    def _():
        y = acc_ref[...] + b_ref[...] + res_ref[...].astype(jnp.float32)
        mean = jnp.mean(y, axis=-1, keepdims=True)
        var = jnp.mean(jnp.square(y - mean), axis=-1, keepdims=True)
        y = (y - mean) * jax.lax.rsqrt(var + jnp.float32(eps))
        o_ref[...] = (y * g_ref[...] + beta_ref[...]).astype(o_ref.dtype)


def qdense_residual_layernorm(x2d, qd, res2d, w_t_bf16, bias, gamma, beta,
                              num_bits, eps):
    """LayerNorm(x2d @ W + b + res2d); K is tiled (reduction), N kept full."""
    M, K = x2d.shape
    K2, N = w_t_bf16.shape
    assert K == K2
    tm = _pick_tile(M, (512, 256, 128))
    tk = _pick_tile(K, (1024, 512, 256))
    grid = (M // tm, K // tk)
    kernel = functools.partial(_qdense_res_ln_kernel,
                               num_bits=int(num_bits), eps=float(eps))
    return pl.pallas_call(
        kernel,
        out_shape=jax.ShapeDtypeStruct((M, N), jnp.float32),
        grid_spec=pltpu.PrefetchScalarGridSpec(
            num_scalar_prefetch=1,
            grid=grid,
            in_specs=[
                pl.BlockSpec((tm, tk), lambda i, k, qd_: (i, k)),
                pl.BlockSpec((tk, N), lambda i, k, qd_: (k, 0)),
                pl.BlockSpec((tm, N), lambda i, k, qd_: (i, 0)),
                pl.BlockSpec((1, N), lambda i, k, qd_: (0, 0)),
                pl.BlockSpec((1, N), lambda i, k, qd_: (0, 0)),
                pl.BlockSpec((1, N), lambda i, k, qd_: (0, 0)),
            ],
            out_specs=pl.BlockSpec((tm, N), lambda i, k, qd_: (i, 0)),
            scratch_shapes=[pltpu.VMEM((tm, N), jnp.float32)],
        ),
        compiler_params=pltpu.CompilerParams(
            dimension_semantics=("parallel", "arbitrary"),
            vmem_limit_bytes=_VMEM_LIMIT),
    )(qd, x2d, w_t_bf16, res2d, bias.reshape(1, N), gamma.reshape(1, N),
      beta.reshape(1, N))


# --------------------- flash-style multi-head attention ---------------------
def _flash_attention_kernel(q_ref, k_ref, v_ref, o_ref, m_sc, l_sc, acc_sc,
                            *, sm_scale):
    kv = pl.program_id(2)

    @pl.when(kv == 0)
    def _():
        m_sc[...] = jnp.full(m_sc.shape, -jnp.inf, jnp.float32)
        l_sc[...] = jnp.zeros(l_sc.shape, jnp.float32)
        acc_sc[...] = jnp.zeros(acc_sc.shape, jnp.float32)

    # Blocks arrive as (tile, nH, d) bf16 slices of the fused qkv buffer;
    # move heads to the leading (batch) position for the MXU.
    q = jnp.swapaxes(q_ref[...], 0, 1)          # (nH, tq,  d) bf16
    k = jnp.swapaxes(k_ref[...], 0, 1)          # (nH, tkv, d) bf16
    v = jnp.swapaxes(v_ref[...], 0, 1)          # (nH, tkv, d) bf16

    s = jnp.einsum("hqd,hkd->hqk", q, k,
                   preferred_element_type=jnp.float32) * sm_scale
    m_new = jnp.maximum(m_sc[...], jnp.max(s, axis=-1, keepdims=True))
    alpha = jnp.exp(m_sc[...] - m_new)
    p = jnp.exp(s - m_new)
    l_sc[...] = alpha * l_sc[...] + jnp.sum(p, axis=-1, keepdims=True)
    acc_sc[...] = alpha * acc_sc[...] + jnp.einsum(
        "hqk,hkd->hqd", p.astype(jnp.bfloat16), v,
        preferred_element_type=jnp.float32)
    m_sc[...] = m_new

    @pl.when(kv == pl.num_programs(2) - 1)
    def _():
        ctx = acc_sc[...] * pl.reciprocal(l_sc[...], approx=True)  # (nH,tq,d)
        o_ref[...] = jnp.swapaxes(ctx, 0, 1).astype(o_ref.dtype)   # (tq,nH,d)


def attention(qkv5, *, sm_scale):
    """qkv5: (B, S, 3, nH, d) bf16 fused q/k/v projection output.
    Returns ctx as (B, S, nH, d) bf16 -- no wrapper-side split/transpose."""
    B, S, three, nH, d = qkv5.shape
    assert three == 3
    tq = _pick_tile(S, (256, 128))
    tkv = _pick_tile(S, (512, 256, 128))
    grid = (B, S // tq, S // tkv)
    kernel = functools.partial(_flash_attention_kernel,
                               sm_scale=float(sm_scale))
    return pl.pallas_call(
        kernel,
        out_shape=jax.ShapeDtypeStruct((B, S, nH, d), jnp.bfloat16),
        grid_spec=pltpu.PrefetchScalarGridSpec(
            num_scalar_prefetch=0,
            grid=grid,
            in_specs=[
                pl.BlockSpec((None, tq, None, nH, d),
                             lambda b, qi, kv: (b, qi, 0, 0, 0)),
                pl.BlockSpec((None, tkv, None, nH, d),
                             lambda b, qi, kv: (b, kv, 1, 0, 0)),
                pl.BlockSpec((None, tkv, None, nH, d),
                             lambda b, qi, kv: (b, kv, 2, 0, 0)),
            ],
            out_specs=pl.BlockSpec((None, tq, nH, d),
                                   lambda b, qi, kv: (b, qi, 0, 0)),
            scratch_shapes=[
                pltpu.VMEM((nH, tq, 1), jnp.float32),
                pltpu.VMEM((nH, tq, 1), jnp.float32),
                pltpu.VMEM((nH, tq, d), jnp.float32),
            ],
        ),
        compiler_params=pltpu.CompilerParams(
            dimension_semantics=("parallel", "parallel", "arbitrary"),
            vmem_limit_bytes=_VMEM_LIMIT),
    )(qkv5, qkv5, qkv5)


# ----------------------------- full QBertLayer ------------------------------
def prepare_params(raw, num_bits):
    """raw weights are PyTorch (out,in).  Quantize + transpose + bf16-cast
    ONCE at setup (weights are static -> nothing in the hot path)."""
    def prep_w(w):
        return fake_quant_host(w, num_bits).T.astype(jnp.bfloat16)  # (in,out)
    w_q, w_k, w_v = prep_w(raw["w_q"]), prep_w(raw["w_k"]), prep_w(raw["w_v"])
    return dict(
        w_qkv_t=jnp.concatenate([w_q, w_k, w_v], axis=1),            # (H, 3H)
        b_qkv=jnp.concatenate([raw["b_q"], raw["b_k"], raw["b_v"]]),
        w_ao_t=prep_w(raw["w_ao"]), b_ao=raw["b_ao"],
        ln1_g=raw["ln1_g"], ln1_b=raw["ln1_b"],
        w_i_t=prep_w(raw["w_i"]), b_i=raw["b_i"],
        w_o_t=prep_w(raw["w_o"]), b_o=raw["b_o"],
        ln2_g=raw["ln2_g"], ln2_b=raw["ln2_b"],
    )


def qbert_layer_forward(hidden_states, params, num_bits, num_grad_bits,
                        n_heads, layer_norm_eps=1e-12):
    del num_grad_bits  # backward-only knob in the reference module
    B, S, H = hidden_states.shape
    d = H // n_heads
    x2d = hidden_states.reshape(B * S, H).astype(jnp.float32)

    # --- self-attention: fused q/k/v projection (one quant pass, bf16 out) --
    qd_x = quant_multipliers(x2d, num_bits)
    qkv = qlinear(x2d, qd_x, params["w_qkv_t"], params["b_qkv"],
                  num_bits)                                  # (M, 3H) bf16
    qkv5 = qkv.reshape(B, S, 3, n_heads, d)                  # free reshape

    ctx = attention(qkv5, sm_scale=1.0 / math.sqrt(d))       # (B,S,nH,d) bf16
    ctx2d = ctx.reshape(B * S, H)

    # --- QBertSelfOutput: dense + (dropout=id) + LayerNorm(residual) --------
    qd_ctx = quant_multipliers(ctx2d, num_bits)
    attn_out = qdense_residual_layernorm(
        ctx2d, qd_ctx, x2d, params["w_ao_t"], params["b_ao"],
        params["ln1_g"], params["ln1_b"], num_bits, layer_norm_eps)  # f32

    # --- feed forward (no chunking: identical result) ------------------------
    qd_a = quant_multipliers(attn_out, num_bits)
    inter = qlinear(attn_out, qd_a, params["w_i_t"], params["b_i"], num_bits,
                    act="gelu")                              # (M, 4H) bf16
    qd_i = quant_multipliers(inter, num_bits)
    layer_out = qdense_residual_layernorm(
        inter, qd_i, attn_out, params["w_o_t"], params["b_o"],
        params["ln2_g"], params["ln2_b"], num_bits, layer_norm_eps)

    return layer_out.reshape(B, S, H)


# ------------------------------ pure-JAX reference ---------------------------
def _ref_quant_apply(x, qd):
    return jnp.round(x.astype(jnp.float32) * qd[0]) * qd[1]


def reference_forward(hidden_states, params, num_bits, n_heads, eps=1e-12):
    B, S, H = hidden_states.shape
    d = H // n_heads
    x2d = hidden_states.reshape(B * S, H).astype(jnp.float32)

    def qlin(x, w_t, b):
        qd = quant_multipliers(x, num_bits)
        xq = _ref_quant_apply(x, qd).astype(jnp.bfloat16).astype(jnp.float32)
        return xq @ w_t.astype(jnp.float32) + b

    qkv = qlin(x2d, params["w_qkv_t"], params["b_qkv"]).astype(jnp.bfloat16)
    qkv5 = qkv.reshape(B, S, 3, n_heads, d)
    q = qkv5[:, :, 0].transpose(0, 2, 1, 3).astype(jnp.float32)   # (B,nH,S,d)
    k = qkv5[:, :, 1].transpose(0, 2, 1, 3).astype(jnp.float32)
    v = qkv5[:, :, 2].transpose(0, 2, 1, 3).astype(jnp.float32)
    s = jnp.einsum("bhqd,bhkd->bhqk", q, k) / math.sqrt(d)
    p = jax.nn.softmax(s, axis=-1).astype(jnp.bfloat16).astype(jnp.float32)
    ctx = jnp.einsum("bhqk,bhkd->bhqd", p, v).astype(jnp.bfloat16)
    ctx2d = ctx.transpose(0, 2, 1, 3).reshape(B * S, H).astype(jnp.float32)

    def ln(y, g, b_):
        m = jnp.mean(y, -1, keepdims=True)
        var = jnp.mean(jnp.square(y - m), -1, keepdims=True)
        return (y - m) / jnp.sqrt(var + eps) * g + b_

    ao = ln(qlin(ctx2d, params["w_ao_t"], params["b_ao"]) + x2d,
            params["ln1_g"], params["ln1_b"])
    inter = jax.nn.gelu(qlin(ao, params["w_i_t"], params["b_i"]),
                        approximate=True).astype(jnp.bfloat16)
    out = ln(qlin(inter.astype(jnp.float32), params["w_o_t"], params["b_o"])
             + ao, params["ln2_g"], params["ln2_b"])
    return out.reshape(B, S, H)


# ---------------------------------- demo -------------------------------------
if __name__ == "__main__":
    B, S, H = 2, 8, 32                 # batch, seq, hidden
    n_heads = 2
    I = 4 * H                          # intermediate size
    num_bits, num_grad_bits = 8, 8

    key = jax.random.PRNGKey(0)
    ks = jax.random.split(key, 16)

    def w(k, shape, scale=0.02):
        return jax.random.normal(k, shape, dtype=jnp.float32) * scale

    hidden_states = jax.random.normal(ks[0], (B, S, H), dtype=jnp.float32)
    raw = dict(
        w_q=w(ks[1], (H, H)), b_q=w(ks[2], (H,)),
        w_k=w(ks[3], (H, H)), b_k=w(ks[4], (H,)),
        w_v=w(ks[5], (H, H)), b_v=w(ks[6], (H,)),
        w_ao=w(ks[7], (H, H)), b_ao=w(ks[8], (H,)),
        ln1_g=1.0 + w(ks[9], (H,), 0.1), ln1_b=w(ks[10], (H,)),
        w_i=w(ks[11], (I, H)), b_i=w(ks[12], (I,)),
        w_o=w(ks[13], (H, I)), b_o=w(ks[14], (H,)),
        ln2_g=1.0 + w(ks[15], (H,), 0.1), ln2_b=jnp.zeros((H,), jnp.float32),
    )
    params = prepare_params(raw, num_bits)

    out = qbert_layer_forward(hidden_states, params, num_bits, num_grad_bits,
                              n_heads)
    out = jax.block_until_ready(out)

    ref = reference_forward(hidden_states, params, num_bits, n_heads)
    assert out.shape == (B, S, H)
    assert jnp.allclose(out, ref, atol=2e-2, rtol=2e-2)

    print("KERNEL_OK")
</pallas_src>

<mosaic_0001>
module attributes {stable_mosaic.version = 11 : i64} {
  func.func @_qlinear_kernel(%arg0: i32, %arg1: i32, %arg2: memref<2xf32, #tpu.memory_space<smem>>, %arg3: memref<16x32xf32, #tpu.memory_space<vmem>>, %arg4: memref<32x96xbf16, #tpu.memory_space<vmem>>, %arg5: memref<1x96xf32, #tpu.memory_space<vmem>>, %arg6: memref<16x96xbf16, #tpu.memory_space<vmem>>) attributes {dimension_semantics = [#tpu.dimension_semantics<parallel>, #tpu.dimension_semantics<parallel>], iteration_bounds = array<i64: 1, 1>, scalar_prefetch = 1 : i64, scratch_operands = 0 : i64, tpu.core_type = #tpu.core_type<tc>, window_params = [{transform_indices = @transform_0, window_bounds = array<i64: 16, 32>}, {transform_indices = @transform_1, window_bounds = array<i64: 32, 96>}, {transform_indices = @transform_2, window_bounds = array<i64: 1, 96>}, {transform_indices = @transform_3, window_bounds = array<i64: 16, 96>}]} {
    %c0 = arith.constant 0 : index
    %c0_0 = arith.constant 0 : index
    %0 = vector.load %arg3[%c0, %c0_0] : memref<16x32xf32, #tpu.memory_space<vmem>>, vector<16x32xf32>
    %c0_1 = arith.constant 0 : index
    %1 = memref.load %arg2[%c0_1] : memref<2xf32, #tpu.memory_space<smem>>
    %2 = vector.broadcast %1 : f32 to vector<16x32xf32>
    %3 = arith.mulf %0, %2 : vector<16x32xf32>
    %4 = math.roundeven %3 : vector<16x32xf32>
    %c1 = arith.constant 1 : index
    %5 = memref.load %arg2[%c1] : memref<2xf32, #tpu.memory_space<smem>>
    %6 = vector.broadcast %5 : f32 to vector<16x32xf32>
    %7 = arith.mulf %4, %6 : vector<16x32xf32>
    %8 = arith.truncf %7 : vector<16x32xf32> to vector<16x32xbf16>
    %c0_2 = arith.constant 0 : index
    %c0_3 = arith.constant 0 : index
    %9 = vector.load %arg4[%c0_2, %c0_3] : memref<32x96xbf16, #tpu.memory_space<vmem>>, vector<32x96xbf16>
    %cst = arith.constant dense<0.000000e+00> : vector<16x96xf32>
    %10 = tpu.matmul %8, %9, %cst {dimension_numbers = #tpu.dot_dimension_numbers<[1], [0], [0], [1], [0, 0, 1, 1], [], []>} : vector<16x32xbf16>, vector<32x96xbf16>, vector<16x96xf32> -> vector<16x96xf32>
    %c0_4 = arith.constant 0 : index
    %c0_5 = arith.constant 0 : index
    %11 = vector.load %arg5[%c0_4, %c0_5] : memref<1x96xf32, #tpu.memory_space<vmem>>, vector<1x96xf32>
    %12 = vector.broadcast %11 : vector<1x96xf32> to vector<16x96xf32>
    %13 = arith.addf %10, %12 : vector<16x96xf32>
    %14 = arith.truncf %13 : vector<16x96xf32> to vector<16x96xbf16>
    %c0_6 = arith.constant 0 : index
    %c0_7 = arith.constant 0 : index
    %15 = vector.load %arg6[%c0_6, %c0_7] : memref<16x96xbf16, #tpu.memory_space<vmem>>, vector<16x96xbf16>
    tpu.vector_store %arg6[%c0_6, %c0_7], %14 {strides = array<i32>} : memref<16x96xbf16, #tpu.memory_space<vmem>>, vector<16x96xbf16>,
    return
  }
  func.func @transform_0(%arg0: i32, %arg1: i32, %arg2: memref<2xf32, #tpu.memory_space<smem>>) -> (i32, i32) {
    %c0_i32 = arith.constant 0 : i32
    %c0_i32_0 = arith.constant 0 : i32
    return %arg0, %c0_i32 : i32, i32
  }
  func.func @transform_1(%arg0: i32, %arg1: i32, %arg2: memref<2xf32, #tpu.memory_space<smem>>) -> (i32, i32) {
    %c0_i32 = arith.constant 0 : i32
    %c0_i32_0 = arith.constant 0 : i32
    return %c0_i32, %arg1 : i32, i32
  }
  func.func @transform_2(%arg0: i32, %arg1: i32, %arg2: memref<2xf32, #tpu.memory_space<smem>>) -> (i32, i32) {
    %c0_i32 = arith.constant 0 : i32
    %c0_i32_0 = arith.constant 0 : i32
    return %c0_i32, %arg1 : i32, i32
  }
  func.func @transform_3(%arg0: i32, %arg1: i32, %arg2: memref<2xf32, #tpu.memory_space<smem>>) -> (i32, i32) {
    %c0_i32 = arith.constant 0 : i32
    return %arg0, %arg1 : i32, i32
  }
}

</mosaic_0001>

<bundles_post_ra>
// kernel: tpu_custom_call.1
= control target key start
LH: loop header
LB: loop body
LE: loop exit
PB: predicated region body
PF: predicated region fallthrough
CT: control target
= control target key end

     0   :  { %s283_s15 = smov [#allocation3]   ;;  %s339_s0 = inlined_call_operand.hbm [shape: f32[2], index: 0, kind: input, shape index: {}]   ;;  %s340_s1 = inlined_call_operand.hbm [shape: f32[16,32], index: 1, kind: input, shape index: {}]   ;;  %s341_s2 = inlined_call_operand.hbm [shape: bf16[32,96], index: 2, kind: input, shape index: {}]   ;;  %s342_s3 = inlined_call_operand.vmem [shape: f32[1,96], index: 3, kind: input, shape index: {}]   ;;  %s343_s4 = inlined_call_operand.hbm [shape: bf16[16,96], index: 4, kind: output, shape index: {}]  }
   0x1   :  { %10 = dma.hbm_to_smem %s339_s0, 16, %s283_s15, [#allocation2] }
   0x2   :  { %275 = dma.done.wait [#allocation2], 16 }
   0x3   :  { %276 = vsyncadd [#allocation2], 4294967280 }
   0x4   :  { %12 = sfence }
   0x5   :  { %13 = vsyncpa [#allocation5], 0 }
   0x6   :  { %14 = vsyncpa [#allocation8], 0 }
   0x7   :  { %15 = vsyncpa [#allocation6], 0  ;;  %s284_s18 = smov [#allocation4]  }
   0x8   :  { %s21_s19 = sshll.u32 %s284_s18, 4  ;;  %s22_s19 = int_to_ptr.vmem [resolvable:$true] %s21_s19 }
   0x9   :  { %s223_s20 = scalar_lea.vmem %s22_s19, 256  ;;  %p228_p1 = scmp.lt.s32.totalorder %s22_s19, %s22_s19 }
   0xa   :  { %p224_p0 = scmp.ne.s32.totalorder %s22_s19, %s223_s20  ;;  %p229_p2 = scmp.lt.s32.totalorder %s223_s20, %s223_s20 }
   0xc   :  { %p230_p3 = por %p229_p2, %p228_p1 }
   0xe   :  { %p231_p4 = pnand %p230_p3, %p224_p0 }
  0x10   :  { %234 = shalt.err (!%p231_p4)
}
  0x11   :  { %s285_s21 = smov 128   ;;  %s286_s22 = smov 8  }
  0x12   :  { %27 = dma.hbm_to_vmem [thread:$0]  %s340_s1, 256, %s22_s19, [#allocation5], %s285_s21, %s285_s21, %s286_s22  }
  0x13   :  { %s287_s24 = smov [#allocation7]  }
  0x14   :  { %s33_s25 = sshll.u32 %s287_s24, 4  ;;  %s34_s25 = int_to_ptr.vmem [resolvable:$true] %s33_s25 }
  0x15   :  { %s243_s26 = scalar_lea.vmem %s34_s25, 256  ;;  %p248_p6 = scmp.lt.s32.totalorder %s34_s25, %s34_s25 }
  0x16   :  { %p244_p5 = scmp.ne.s32.totalorder %s34_s25, %s243_s26  ;;  %p249_p7 = scmp.lt.s32.totalorder %s243_s26, %s243_s26 }
  0x18   :  { %p250_p8 = por %p249_p7, %p248_p6 }
  0x1a   :  { %p251_p9 = pnand %p250_p8, %p244_p5 }
  0x1c   :  { %254 = shalt.err (!%p251_p9)
}
  0x1d   :  { %s288_s27 = smov 64   ;;  %s289_s28 = smov 4  }
  0x1e   :  { %39 = dma.hbm_to_vmem [thread:$0]  %s341_s2, 256, %s34_s25, [#allocation8], %s288_s27, %s288_s27, %s289_s28  }
  0x1f   :  { %277 = dma.done.wait [#allocation5], 256  }
  0x20   :  { %278 = vsyncadd [#allocation5], 4294967040 }
  0x21   :  { %279 = dma.done.wait [#allocation8], 256  }
  0x22   :  { %280 = vsyncadd [#allocation8], 4294967040  ;;  %v290_v0 = vmov 0.0   ;;  %vm291_vm0 = vmmov 0   ;;  %s51_s1 = sld [smem:[#allocation3]]  ;;  %v205_v1 = vld [vmem:[#allocation7 + $0x8] sm:$0xff]  }
  0x23   :  { %171 = vmatprep.subr.bf16.mxu0 %v290_v0  ;;  %175 = vmatprep.mubr.msk.bf16.mxu0 %vm291_vm0, %v290_v0  ;;  %v206_v3 = vld [vmem:[#allocation7] sm:$0xff]   ;;  %v49_v4 = vld [vmem:[#allocation4] sm:$0xff]  ;;  %v50_v5 = vld [vmem:[#allocation4 + $0x8] sm:$0xff]  ;;  %s159_s5 = sld [smem:[#allocation3 + $0x1]]  ;;  %vm85_vm3 = vcmask 261120   ;;  %vm138_vm4 = vcmask 781312  }
  0x24   :  { %172 = vmatpush3.bf16.msra.mxu0 %v205_v1  ;;  %v160_v26 = vld [vmem:[%s342_s3] ss:$0 sm:$0xff]  ;;  %s292_s7 = smov [#allocation9]  }
  0x25   :  { %173 = vmatprep.subr.bf16.mxu0 %v290_v0  ;;  %s146_s8 = sshll.u32 %s292_s7, 4  ;;  %s147_s8 = int_to_ptr.vmem [resolvable:$true] %s146_s8 }
  0x26   :  { %s255_s9 = scalar_lea.vmem %s147_s8, 128  ;;  %p260_p11 = scmp.lt.s32.totalorder %s147_s8, %s147_s8 }
  0x27   :  { %p256_p10 = scmp.ne.s32.totalorder %s147_s8, %s255_s9  ;;  %p261_p12 = scmp.lt.s32.totalorder %s255_s9, %s255_s9 }
  0x28   :  { %v52_v2 = vstv %s51_s1  ;;  %174 = vmatpush3.bf16.msra.mxu0 %v206_v3 }
  0x29   :  { %v53_v6 = vmul.f32 %v52_v2, %v49_v4  ;;  %v54_v7 = vmul.f32 %v52_v2, %v50_v5  ;;  %v58_v19 = vstv %s159_s5  ;;  %p262_p13 = por %p261_p12, %p260_p11 }
  0x2b   :  { %v181_v8 = vcvt.f32.s32 %v53_v6  ;;  %v179_v9 = vand.u32 2147483647, %v53_v6  ;;  %v189_v10 = vcvt.f32.s32 %v54_v7  ;;  %v184_v12 = vand.u32 2147483648, %v53_v6  ;;  %p263_p0 = pnand %p262_p13, %p256_p10 }
  0x2c   :  { %v187_v13 = vand.u32 2147483647, %v54_v7  ;;  %v192_v15 = vand.u32 2147483648, %v54_v7 }
  0x2d   :  { %v182_v11 = vcvt.s32.f32 %v181_v8  ;;  %v190_v14 = vcvt.s32.f32 %v189_v10  ;;  %vm180_vm1 = vcmp.lt.f32.partialorder %v179_v9, 8388608.0 }
  0x2e   :  { %vm188_vm2 = vcmp.lt.f32.partialorder %v187_v13, 8388608.0 }
  0x2f   :  { %v183_v16 = vand.u32 2147483647, %v182_v11  ;;  %v191_v17 = vand.u32 2147483647, %v190_v14 }
  0x31   :  { %v185_v18 = vor.u32 %v184_v12, %v183_v16  ;;  %v193_v20 = vor.u32 %v192_v15, %v191_v17 }
  0x33   :  { %v186_v21 = vsel %vm180_vm1, %v185_v18, %v53_v6  ;;  %v194_v22 = vsel %vm188_vm2, %v193_v20, %v54_v7 }
  0x34   :  { %v59_v23 = vmul.f32 %v186_v21, %v58_v19  ;;  %v60_v24 = vmul.f32 %v194_v22, %v58_v19 }
  0x36   :  { %v61_v25 = vpack.c.bf16 %v60_v24, %v59_v23 }
  0x38   :  { %176 = vmatmul.mubr.msk.bf16.vlgmr.msra.gmra.mxu0 %vm85_vm3, %v61_v25 }
  0xf8   :  { %v123_v27 = vpop.f32.mrf.mxu0 }
  0xf9   :  { %v124_v28 = vadd.f32 %v160_v26, %v123_v27 }
  0xfa   :  { %v177_v29 = vpop.f32.mrf.mxu0 }
  0xfb   :  { %v166_v30 = vpack.c.bf16 %v124_v28, %v124_v28 }
  0xfc   :  { %v126_v31 = vpop.f32.mrf.mxu0 }
  0xfd   :  { %v127_v32 = vadd.f32 %v160_v26, %v126_v31  ;;  %139 = vst.msk [vmem:[#allocation9] sm:$0xf] %vm138_vm4, %v166_v30 }
  0xfe   :  { %v178_v33 = vpop.f32.mrf.mxu0 }
  0xff   :  { %v167_v34 = vpack.c.bf16 %v127_v32, %v127_v32 }
 0x101   :  { %140 = vst.msk [vmem:[#allocation9 + $0x4] sm:$0xf] %vm138_vm4, %v167_v34 }
 0x102   :  { %266 = shalt.err (!%p263_p0)
}
 0x103   :  { %152 = dma.vmem_to_hbm [thread:$0]  %s147_s8, 128, %s343_s4, [#allocation6], %s288_s27, %s288_s27, %s289_s28  }
 0x104   :  { %281 = dma.done.wait [#allocation6], 128  }
 0x105   :  { %282 = vsyncadd [#allocation6], 4294967168 }
 0x106   :  { %156 = vsyncpa [#allocation5], 1 }
 0x107   :  { %157 = vsyncpa [#allocation8], 1 }
 0x108   :  { %158 = vsyncpa [#allocation6], 1 }

</bundles_post_ra>
